<compile_context>
chip_gen: v7x
topology: tpu7x:2x2x1
jax: 0.10.0
libtpu: 0.0.40
codegen_flags: <defaults>
</compile_context>

<pallas_src>
import functools

import jax
import jax.numpy as jnp
from jax.experimental import pallas as pl
from jax.experimental.pallas import tpu as pltpu

IN_FEATURES = 16
OUT_FEATURES = 8
NUM_BITS = 4
QMAX = 2 ** (NUM_BITS - 1) - 1   # 7
QMIN = -(2 ** (NUM_BITS - 1))    # -8


def _quantized_linear_kernel(xT_ref, w_ref, oT_ref, *, compute_dtype):
    """xT_ref: (16, TB), w_ref: (8, 16), oT_ref: (8, TB) — all VMEM blocks."""
    w = w_ref[...].astype(jnp.float32)

    # Symmetric per-output-channel int4 fake quantization of the weight.
    amax = jnp.max(jnp.abs(w), axis=1, keepdims=True)            # (8, 1)
    scale = amax / jnp.float32(QMAX)
    # Guard against an all-zero row (scale == 0) -> quantized weight is 0.
    safe_scale = jnp.where(scale == 0.0, jnp.float32(1.0), scale)
    q = jnp.clip(jnp.round(w / safe_scale), jnp.float32(QMIN), jnp.float32(QMAX))
    w_fq = q * scale                                             # (8, 16)

    xT = xT_ref[...]
    if compute_dtype == jnp.float32:
        xT = xT.astype(jnp.float32)
    else:
        # Optional bf16 MXU path (gated; changes numerics slightly).
        xT = xT.astype(compute_dtype)
        w_fq = w_fq.astype(compute_dtype)

    # y.T = W_fq @ x.T  — both operands consumed by the MXU directly (no
    # in-kernel transpose), f32 accumulation, lane-dense (8, TB) store.
    oT_ref[...] = jax.lax.dot_general(
        w_fq,
        xT,
        dimension_numbers=(((1,), (0,)), ((), ())),
        preferred_element_type=jnp.float32,
    ).astype(oT_ref.dtype)


def simple_test_network_forward(
    x: jax.Array,
    weight: jax.Array,
    *,
    block_batch: int = 2048,
    use_bf16: bool = False,
) -> jax.Array:
    """Pallas implementation of SimpleTestNetwork.forward.

    x:      (B, 16) float32
    weight: (8, 16) float32 (nn.Linear layout: out_features x in_features)
    returns (B, 8) float32
    """
    batch = x.shape[0]
    assert x.shape[1] == IN_FEATURES
    assert weight.shape == (OUT_FEATURES, IN_FEATURES)

    # Pad the batch so the lane dimension of the transposed problem is a
    # multiple of 128 and of the batch tile; padded rows are zero and their
    # (zero) outputs are sliced off below.
    b128 = max(128, ((batch + 127) // 128) * 128)
    tb = min(block_batch, b128)
    b_pad = ((b128 + tb - 1) // tb) * tb
    grid = (b_pad // tb,)

    x_pad = x if b_pad == batch else jnp.pad(x, ((0, b_pad - batch), (0, 0)))
    xT = x_pad.T  # (16, b_pad)

    compute_dtype = jnp.bfloat16 if use_bf16 else jnp.float32
    kernel = functools.partial(_quantized_linear_kernel, compute_dtype=compute_dtype)

    cost = pl.CostEstimate(
        flops=2 * b_pad * IN_FEATURES * OUT_FEATURES,
        transcendentals=0,
        bytes_accessed=4 * (b_pad * IN_FEATURES
                            + OUT_FEATURES * IN_FEATURES
                            + b_pad * OUT_FEATURES),
    )

    yT = pl.pallas_call(
        kernel,
        out_shape=jax.ShapeDtypeStruct((OUT_FEATURES, b_pad), jnp.float32),
        grid_spec=pl.GridSpec(
            grid=grid,
            in_specs=[
                # x.T: batch-tiled, lane-dense blocks.
                pl.BlockSpec((IN_FEATURES, tb), lambda i: (0, i)),
                # Weight: same tiny block every step -> stays resident in VMEM.
                pl.BlockSpec((OUT_FEATURES, IN_FEATURES), lambda i: (0, 0)),
            ],
            out_specs=pl.BlockSpec((OUT_FEATURES, tb), lambda i: (0, i)),
        ),
        compiler_params=pltpu.CompilerParams(
            dimension_semantics=("parallel",),       # shardable across v7x TCs
            vmem_limit_bytes=32 * 1024 * 1024,       # tiles are ~KBs; safe on v7x
        ),
        cost_estimate=cost,
    )(xT, weight)

    # Un-transpose and drop the batch padding.
    return yT.T[:batch, :]


def _reference_forward(x, weight):
    """Pure-JAX reference matching the PyTorch module semantics."""
    amax = jnp.max(jnp.abs(weight), axis=1, keepdims=True)
    scale = amax / QMAX
    safe_scale = jnp.where(scale == 0.0, 1.0, scale)
    q = jnp.clip(jnp.round(weight / safe_scale), QMIN, QMAX)
    w_fq = q * scale
    return x @ w_fq.T


if __name__ == "__main__":
    key = jax.random.PRNGKey(0)
    k_x, k_w, k_x2 = jax.random.split(key, 3)

    # Small shape consistent with the module (Linear(16 -> 8), no bias).
    batch = 8
    x = jax.random.normal(k_x, (batch, IN_FEATURES), dtype=jnp.float32)
    weight = (
        jax.random.normal(k_w, (OUT_FEATURES, IN_FEATURES), dtype=jnp.float32) * 0.1
    )

    out = simple_test_network_forward(x, weight)
    out = jax.block_until_ready(out)
    ref = _reference_forward(x, weight)
    assert out.shape == (batch, OUT_FEATURES)
    assert jnp.allclose(out, ref, atol=1e-5, rtol=1e-5), "mismatch vs reference"

    # Second check: non-multiple-of-128 batch with a small tile so the grid
    # has >1 step, exercising batch tiling + padding + the resident weight.
    batch2 = 300
    x2 = jax.random.normal(k_x2, (batch2, IN_FEATURES), dtype=jnp.float32)
    out2 = jax.block_until_ready(
        simple_test_network_forward(x2, weight, block_batch=128)
    )
    ref2 = _reference_forward(x2, weight)
    assert out2.shape == (batch2, OUT_FEATURES)
    assert jnp.allclose(out2, ref2, atol=1e-5, rtol=1e-5), "tiled mismatch vs reference"

    print("KERNEL_OK")
</pallas_src>

<mosaic_0001>
module attributes {stable_mosaic.version = 11 : i64} {
  func.func @_quantized_linear_kernel(%arg0: i32, %arg1: memref<16x128xf32, #tpu.memory_space<vmem>>, %arg2: memref<8x16xf32, #tpu.memory_space<vmem>>, %arg3: memref<8x128xf32, #tpu.memory_space<vmem>>) attributes {dimension_semantics = [#tpu.dimension_semantics<parallel>], iteration_bounds = array<i64: 1>, scalar_prefetch = 0 : i64, scratch_operands = 0 : i64, tpu.core_type = #tpu.core_type<tc>, window_params = [{transform_indices = @transform_0, window_bounds = array<i64: 16, 128>}, {pipeline_mode = #tpu.pipeline_mode<synchronous>, transform_indices = @transform_1, window_bounds = array<i64: 8, 16>}, {transform_indices = @transform_2, window_bounds = array<i64: 8, 128>}]} {
    %c0 = arith.constant 0 : index
    %c0_0 = arith.constant 0 : index
    %0 = vector.load %arg2[%c0, %c0_0] : memref<8x16xf32, #tpu.memory_space<vmem>>, vector<8x16xf32>
    %1 = math.absf %0 : vector<8x16xf32>
    %cst = arith.constant dense<0xFF800000> : vector<8xf32>
    %2 = vector.multi_reduction <maximumf>, %1, %cst [1] : vector<8x16xf32> to vector<8xf32>
    %3 = vector.shape_cast %2 : vector<8xf32> to vector<8x1xf32>
    %cst_1 = arith.constant 7.000000e+00 : f32
    %4 = vector.broadcast %cst_1 : f32 to vector<8x1xf32>
    %5 = arith.divf %3, %4 : vector<8x1xf32>
    %cst_2 = arith.constant 0.000000e+00 : f32
    %6 = vector.broadcast %cst_2 : f32 to vector<8x1xf32>
    %7 = arith.cmpf oeq, %5, %6 : vector<8x1xf32>
    %cst_3 = arith.constant 1.000000e+00 : f32
    %8 = vector.broadcast %cst_3 : f32 to vector<8x1xf32>
    %9 = arith.select %7, %8, %5 : vector<8x1xi1>, vector<8x1xf32>
    %10 = vector.broadcast %9 : vector<8x1xf32> to vector<8x16xf32>
    %11 = arith.divf %0, %10 : vector<8x16xf32>
    %12 = math.roundeven %11 : vector<8x16xf32>
    %cst_4 = arith.constant -8.000000e+00 : f32
    %cst_5 = arith.constant 7.000000e+00 : f32
    %13 = vector.broadcast %cst_4 : f32 to vector<8x16xf32>
    %14 = arith.maximumf %13, %12 : vector<8x16xf32>
    %15 = vector.broadcast %cst_5 : f32 to vector<8x16xf32>
    %16 = arith.minimumf %15, %14 : vector<8x16xf32>
    %17 = vector.broadcast %5 : vector<8x1xf32> to vector<8x16xf32>
    %18 = arith.mulf %16, %17 : vector<8x16xf32>
    %c0_6 = arith.constant 0 : index
    %c0_7 = arith.constant 0 : index
    %19 = vector.load %arg1[%c0_6, %c0_7] : memref<16x128xf32, #tpu.memory_space<vmem>>, vector<16x128xf32>
    %cst_8 = arith.constant dense<0.000000e+00> : vector<8x128xf32>
    %20 = tpu.matmul %18, %19, %cst_8 {dimension_numbers = #tpu.dot_dimension_numbers<[1], [0], [0], [1], [0, 0, 1, 1], [], []>} : vector<8x16xf32>, vector<16x128xf32>, vector<8x128xf32> -> vector<8x128xf32>
    %c0_9 = arith.constant 0 : index
    %c0_10 = arith.constant 0 : index
    %21 = vector.load %arg3[%c0_9, %c0_10] : memref<8x128xf32, #tpu.memory_space<vmem>>, vector<8x128xf32>
    tpu.vector_store %arg3[%c0_9, %c0_10], %20 {strides = array<i32>} : memref<8x128xf32, #tpu.memory_space<vmem>>, vector<8x128xf32>,
    return
  }
  func.func @transform_0(%arg0: i32) -> (i32, i32) {
    %c0_i32 = arith.constant 0 : i32
    %c0_i32_0 = arith.constant 0 : i32
    return %c0_i32, %arg0 : i32, i32
  }
  func.func @transform_1(%arg0: i32) -> (i32, i32) {
    %c0_i32 = arith.constant 0 : i32
    %c0_i32_0 = arith.constant 0 : i32
    %c0_i32_1 = arith.constant 0 : i32
    return %c0_i32, %c0_i32_0 : i32, i32
  }
  func.func @transform_2(%arg0: i32) -> (i32, i32) {
    %c0_i32 = arith.constant 0 : i32
    %c0_i32_0 = arith.constant 0 : i32
    return %c0_i32, %arg0 : i32, i32
  }
}

</mosaic_0001>

<bundles_post_ra>
// kernel: tpu_custom_call.1
= control target key start
LH: loop header
LB: loop body
LE: loop exit
PB: predicated region body
PF: predicated region fallthrough
CT: control target
= control target key end

     0   :  { %7 = vsyncpa [#allocation3], 0  ;;  %s304_s0 = inlined_call_operand.hbm [shape: f32[16,128], index: 0, kind: input, shape index: {}]   ;;  %s305_s1 = inlined_call_operand.hbm [shape: f32[8,16], index: 1, kind: input, shape index: {}]   ;;  %s306_s2 = inlined_call_operand.hbm [shape: f32[8,128], index: 2, kind: output, shape index: {}]  }
   0x1   :  { %8 = vsyncpa [#allocation6], 0 }
   0x2   :  { %9 = vsyncpa [#allocation4], 0  ;;  %s243_s9 = smov [#allocation2]   ;;  %s171_s13 = scalar_lea.hbm %s304_s0, 256 }
   0x3   :  { %s15_s10 = sshll.u32 %s243_s9, 4  ;;  %p172_p0 = scmp.ne.s32.totalorder %s304_s0, %s171_s13  ;;  %s16_s10 = int_to_ptr.vmem [resolvable:$true] %s15_s10 }
   0x4   :  { %p175_p1 = scmp.lt.u32.totalorder %s171_s13, %s304_s0 }
   0x6   :  { %p177_p2 = pnand %p175_p1, %p172_p0 }
   0x8   :  { %180 = shalt.err (!%p177_p2)
}
   0x9   :  { %s181_s18 = scalar_lea.vmem %s16_s10, 256  ;;  %p186_p4 = scmp.lt.s32.totalorder %s16_s10, %s16_s10 }
   0xa   :  { %p182_p3 = scmp.ne.s32.totalorder %s16_s10, %s181_s18  ;;  %p187_p5 = scmp.lt.s32.totalorder %s181_s18, %s181_s18 }
   0xc   :  { %p188_p6 = por %p187_p5, %p186_p4 }
   0xe   :  { %p189_p7 = pnand %p188_p6, %p182_p3 }
  0x10   :  { %192 = shalt.err (!%p189_p7)
}
  0x11   :  { %s244_s19 = smov 128   ;;  %s245_s20 = smov 8  }
  0x12   :  { %21 = dma.hbm_to_vmem [thread:$0]  %s304_s0, 256, %s16_s10, [#allocation3], %s244_s19, %s244_s19, %s245_s20  }
  0x13   :  { %s246_s23 = smov [#allocation5]   ;;  %s193_s27 = scalar_lea.hbm %s305_s1, 128 }
  0x14   :  { %s28_s24 = sshll.u32 %s246_s23, 4  ;;  %p194_p8 = scmp.ne.s32.totalorder %s305_s1, %s193_s27  ;;  %s29_s24 = int_to_ptr.vmem [resolvable:$true] %s28_s24 }
  0x15   :  { %p197_p9 = scmp.lt.u32.totalorder %s193_s27, %s305_s1 }
  0x17   :  { %p199_p10 = pnand %p197_p9, %p194_p8 }
  0x19   :  { %202 = shalt.err (!%p199_p10)
}
  0x1a   :  { %s203_s4 = scalar_lea.vmem %s29_s24, 128  ;;  %p208_p12 = scmp.lt.s32.totalorder %s29_s24, %s29_s24 }
  0x1b   :  { %p204_p11 = scmp.ne.s32.totalorder %s29_s24, %s203_s4  ;;  %p209_p13 = scmp.lt.s32.totalorder %s203_s4, %s203_s4 }
  0x1d   :  { %p210_p0 = por %p209_p13, %p208_p12 }
  0x1f   :  { %p211_p1 = pnand %p210_p0, %p204_p11 }
  0x21   :  { %214 = shalt.err (!%p211_p1)
}
  0x22   :  { %31 = dma.hbm_to_vmem [thread:$0]  %s305_s1, 128, %s29_s24, [#allocation6]  }
  0x23   :  { %237 = dma.done.wait [#allocation3], 256  }
  0x24   :  { %238 = vsyncadd [#allocation3], 4294967040 }
  0x25   :  { %239 = dma.done.wait [#allocation6], 128  }
  0x26   :  { %240 = vsyncadd [#allocation6], 4294967168  ;;  %v38_v0 = vld [vmem:[#allocation5] sm:$0xff]  ;;  %vm40_vm0 = vcmask 130048   ;;  %v54_v3 = vld [vmem:[#allocation2] sm:$0xff]  ;;  %v247_v6 = vmov 0.0|0.0  }
  0x27   :  { %v39_v1 = vand.u32 2147483647, %v38_v0  ;;  %v55_v4 = vld [vmem:[#allocation2 + $0x8] sm:$0xff]  ;;  %157 = vmatprep.subr.bf16.mxu0 %v247_v6  ;;  %vm248_vm1 = vmmov 0   ;;  %v249_v7 = vmov 0.0   ;;  %s250_s1 = smov [#allocation7]  }
  0x28   :  { %v158_v5 = vpack.c.bf16 %v55_v4, %v54_v3  ;;  %154 = vmatprep.mubr.msk.f32.mxu0 %vm248_vm1, %v249_v7  ;;  %s136_s6 = sshll.u32 %s250_s1, 4  ;;  %s137_s6 = int_to_ptr.vmem [resolvable:$true] %s136_s6 }
  0x29   :  { %v41_v2 = vsel %vm40_vm0, %v39_v1, -inf  ;;  %s215_s7 = scalar_lea.vmem %s137_s6, 128  ;;  %p220_p3 = scmp.lt.s32.totalorder %s137_s6, %s137_s6 }
  0x2a   :  { %42 = vmax.xlane.f32.xlu0 %v41_v2  ;;  %159 = vmatpush3.bf16.msra.mxu0 %v158_v5  ;;  %p216_p2 = scmp.ne.s32.totalorder %s137_s6, %s215_s7  ;;  %p221_p4 = scmp.lt.s32.totalorder %s215_s7, %s215_s7 }
  0x2c   :  { %p222_p5 = por %p221_p4, %p220_p3 }
  0x2e   :  { %p223_p6 = pnand %p222_p5, %p216_p2 }
  0xb7   :  { %v43_v8 = vpop.xlane.xlu0 %42 }
  0xb8   :  { %v45_v9 = vmul.f32 0.14285715, %v43_v8 }
  0xba   :  { %vm46_vm2 = vcmp.eq.f32.partialorder %v45_v9, 0.0 }
  0xbb   :  { %v47_v10 = vsel %vm46_vm2, 1.0, %v45_v9 }
  0xbc   :  { %169 = vrcp.f32 %v47_v10 }
  0xc6   :  { %v170_v11 = vpop.eup %169 }
  0xc7   :  { %v49_v12 = vmul.f32 %v170_v11, %v38_v0 }
  0xc9   :  { %v160_v13 = vround.rtne.f32 %v49_v12 }
  0xcb   :  { %v51_v14 = vmax.f32 %v160_v13, -8.0 }
  0xcd   :  { %v52_v15 = vmin.f32 %v51_v14, 7.0 }
  0xcf   :  { %v53_v16 = vmul.f32 %v52_v15, %v45_v9 }
  0xd1   :  { %155 = vmatmul.mubr.msk.f32.vlgmr.msra.gmra.mrb[0].mxu0 %vm40_vm0, %v53_v16 }
 0x1a4   :  { %v125_v17 = vpop.f32.mrb[0].mxu0 }
 0x1a5   :  { %129 = vst [vmem:[#allocation7] sm:$0xff] %v125_v17  ;;  %v156_v18 = vpop.f32.mrb[1].mxu0 }
 0x1a6   :  { %226 = shalt.err (!%p223_p6)
}
 0x1a7   :  { %s227_s10 = scalar_lea.hbm %s306_s2, 128 }
 0x1a8   :  { %p228_p7 = scmp.ne.s32.totalorder %s306_s2, %s227_s10  ;;  %p231_p8 = scmp.lt.u32.totalorder %s227_s10, %s306_s2 }
 0x1aa   :  { %p233_p9 = pnand %p231_p8, %p228_p7 }
 0x1ac   :  { %236 = shalt.err (!%p233_p9)
}
 0x1ad   :  { %139 = dma.vmem_to_hbm [thread:$0]  %s137_s6, 128, %s306_s2, [#allocation4]  }
 0x1ae   :  { %241 = dma.done.wait [#allocation4], 128  }
 0x1af   :  { %242 = vsyncadd [#allocation4], 4294967168 }
 0x1b0   :  { %143 = vsyncpa [#allocation3], 1 }
 0x1b1   :  { %144 = vsyncpa [#allocation6], 1 }
 0x1b2   :  { %145 = vsyncpa [#allocation4], 1 }

</bundles_post_ra>
